<compile_context>
chip_gen: v6e
topology: v6e:2x2x1
jax: 0.10.0
libtpu: 0.0.40
codegen_flags: <defaults>
</compile_context>

<pallas_src>
import jax
import jax.numpy as jnp
from jax.experimental import pallas as pl
from jax.experimental.pallas import tpu as pltpu


def _shift_sample_kernel(x_ref, wy_ref, wxt_ref, o_ref):
    # x_ref:   (B, c, h, w)   unpadded images
    # wy_ref:  (B, h, h)      row (y) bilinear weights with replicate-pad folded in
    # wxt_ref: (B, h, w)      column (x) bilinear weights with replicate-pad folded in
    # o_ref:   (B, c, h, w)   shifted output
    num_images = x_ref.shape[0]
    num_channels = x_ref.shape[1]

    def body(b, carry):
        wy = wy_ref[b]                                                     # (h, h)
        wxt = wxt_ref[b]                                                   # (h, w)
        for ch in range(num_channels):                                     # static, small
            t = jnp.dot(wy, x_ref[b, ch], preferred_element_type=jnp.float32)   # (h, w)
            o = jnp.dot(t.astype(wxt.dtype), wxt,
                        preferred_element_type=jnp.float32)                      # (h, w)
            o_ref[b, ch] = o.astype(o_ref.dtype)
        return carry

    jax.lax.fori_loop(0, num_images, body, 0, unroll=True)


def _pick_block_images(num_images, max_images=8):
    """Largest divisor of N that is <= max_images, preferring >= 2 grid steps (v7x: 2 TCs)."""
    divisors = [b for b in range(1, max_images + 1) if num_images % b == 0]
    two_step = [b for b in divisors if num_images // b >= 2]
    return max(two_step) if two_step else max(divisors)


def _bilinear_weight_matrix(coord_norm, size):
    """(N, m) normalized coords -> (N, m, size) bilinear tap weights (float32).

    Out-of-range taps get weight 0, reproducing grid_sample padding_mode='zeros'."""
    pix = (coord_norm + 1.0) * (size * 0.5) - 0.5
    i0 = jnp.floor(pix)
    f = pix - i0
    idx = jnp.arange(size, dtype=jnp.float32)[None, None, :]
    return ((idx == i0[:, :, None]).astype(jnp.float32) * (1.0 - f)[:, :, None]
            + (idx == (i0[:, :, None] + 1.0)).astype(jnp.float32) * f[:, :, None])


def _sampling_weights(num_images, h, pad, key):
    """Per-image separable bilinear weights vs the padded image: Wy (N,h,Hp), WxT (N,Hp,w)."""
    Hp = h + 2 * pad
    eps = 1.0 / Hp
    arange = jnp.linspace(-1.0 + eps, 1.0 - eps, Hp, dtype=jnp.float32)[:h]
    shift = jax.random.randint(key, (num_images, 2), 0, 2 * pad + 1).astype(jnp.float32)
    shift = shift * (2.0 / Hp)
    x_norm = arange[None, :] + shift[:, 0:1]   # x coordinate per column (N, w)
    y_norm = arange[None, :] + shift[:, 1:2]   # y coordinate per row    (N, h)
    wy = _bilinear_weight_matrix(y_norm, Hp)                                   # (N, h, Hp)
    wxt = jnp.transpose(_bilinear_weight_matrix(x_norm, Hp), (0, 2, 1))        # (N, Hp, w)
    return wy, wxt


def _folded_weights(num_images, h, pad, key):
    """Weights that act on the UNPADDED image: replicate padding folded via the clamp map."""
    Hp = h + 2 * pad
    wy, wxt = _sampling_weights(num_images, h, pad, key)           # (N,h,Hp), (N,Hp,w) f32
    clamp = jnp.clip(jnp.arange(Hp) - pad, 0, h - 1)
    fold = (clamp[:, None] == jnp.arange(h)[None, :]).astype(jnp.float32)      # (Hp, h)
    wy_f = jnp.einsum("nip,pr->nir", wy, fold)                                  # (N, h, h)
    wxt_f = jnp.einsum("qs,nqj->nsj", fold, wxt)                                # (N, h, w)
    return wy_f, wxt_f


def random_shifts_aug(x, pad, key, *, max_block_images=8):
    n, v, c, h, w = x.shape
    assert h == w
    dtype = x.dtype
    N = n * v

    wy_f, wxt_f = _folded_weights(N, h, pad, key)
    x_flat = x.reshape(N, c, h, w)
    B = _pick_block_images(N, max_block_images)

    out = pl.pallas_call(
        _shift_sample_kernel,
        out_shape=jax.ShapeDtypeStruct((N, c, h, w), dtype),
        grid_spec=pltpu.PrefetchScalarGridSpec(
            num_scalar_prefetch=0,
            grid=(N // B,),
            in_specs=[
                pl.BlockSpec((B, c, h, w), lambda i: (i, 0, 0, 0)),
                pl.BlockSpec((B, h, h), lambda i: (i, 0, 0)),
                pl.BlockSpec((B, h, w), lambda i: (i, 0, 0)),
            ],
            out_specs=pl.BlockSpec((B, c, h, w), lambda i: (i, 0, 0, 0)),
        ),
        compiler_params=pltpu.CompilerParams(
            dimension_semantics=("parallel",),
        ),
    )(x_flat, wy_f.astype(dtype), wxt_f.astype(dtype))

    return out.reshape(n, v, c, h, w)


if __name__ == "__main__":
    key = jax.random.PRNGKey(0)
    k_x, k_shift = jax.random.split(key)

    # Small shapes: n=2 envs, v=2 views, c=4 channels, 24x24 images.
    n, v, c, h = 2, 2, 4, 24
    img_size = h
    pad = int(img_size / 21)   # cfg.img_size / 21 -> pad = 1 here

    x = jax.random.uniform(k_x, (n, v, c, h, h), dtype=jnp.float32)

    out = random_shifts_aug(x, pad, k_shift)
    out = jax.block_until_ready(out)
    assert out.shape == (n, v, c, h, h), out.shape

    # Pure-JAX reference: replicate pad + unfolded separable bilinear sampling.
    N = n * v
    xp = jnp.pad(x.reshape(N, c, h, h), ((0, 0), (0, 0), (pad, pad), (pad, pad)), mode="edge")
    wy_ref, wxt_ref = _sampling_weights(N, h, pad, k_shift)
    ref = jnp.einsum("nip,ncpq,nqj->ncij",
                     wy_ref.astype(x.dtype), xp, wxt_ref.astype(x.dtype)).reshape(n, v, c, h, h)
    assert jnp.allclose(out, ref, rtol=1e-5, atol=1e-5)

    print("KERNEL_OK")
</pallas_src>

<mosaic_0001>
module attributes {stable_mosaic.version = 11 : i64} {
  func.func @_shift_sample_kernel(%arg0: i32, %arg1: memref<2x4x24x24xf32, #tpu.memory_space<vmem>>, %arg2: memref<2x24x24xf32, #tpu.memory_space<vmem>>, %arg3: memref<2x24x24xf32, #tpu.memory_space<vmem>>, %arg4: memref<2x4x24x24xf32, #tpu.memory_space<vmem>>) attributes {dimension_semantics = [#tpu.dimension_semantics<parallel>], iteration_bounds = array<i64: 2>, scalar_prefetch = 0 : i64, scratch_operands = 0 : i64, tpu.core_type = #tpu.core_type<tc>, window_params = [{transform_indices = @transform_0, window_bounds = array<i64: 2, 4, 24, 24>}, {transform_indices = @transform_1, window_bounds = array<i64: 2, 24, 24>}, {transform_indices = @transform_2, window_bounds = array<i64: 2, 24, 24>}, {transform_indices = @transform_3, window_bounds = array<i64: 2, 4, 24, 24>}]} {
    %c0_i32 = arith.constant 0 : i32
    %0 = arith.index_cast %c0_i32 : i32 to index
    %c0 = arith.constant 0 : index
    %c0_0 = arith.constant 0 : index
    %1 = vector.load %arg2[%0, %c0, %c0_0] : memref<2x24x24xf32, #tpu.memory_space<vmem>>, vector<1x24x24xf32>
    %2 = vector.shape_cast %1 : vector<1x24x24xf32> to vector<24x24xf32>
    %3 = arith.index_cast %c0_i32 : i32 to index
    %c0_1 = arith.constant 0 : index
    %c0_2 = arith.constant 0 : index
    %4 = vector.load %arg3[%3, %c0_1, %c0_2] : memref<2x24x24xf32, #tpu.memory_space<vmem>>, vector<1x24x24xf32>
    %5 = vector.shape_cast %4 : vector<1x24x24xf32> to vector<24x24xf32>
    %6 = arith.index_cast %c0_i32 : i32 to index
    %c0_3 = arith.constant 0 : index
    %c0_4 = arith.constant 0 : index
    %c0_5 = arith.constant 0 : index
    %7 = vector.load %arg1[%6, %c0_3, %c0_4, %c0_5] : memref<2x4x24x24xf32, #tpu.memory_space<vmem>>, vector<1x1x24x24xf32>
    %8 = vector.shape_cast %7 : vector<1x1x24x24xf32> to vector<24x24xf32>
    %cst = arith.constant dense<0.000000e+00> : vector<24x24xf32>
    %9 = tpu.matmul %2, %8, %cst {dimension_numbers = #tpu.dot_dimension_numbers<[1], [0], [0], [1], [0, 0, 1, 1], [], []>} : vector<24x24xf32>, vector<24x24xf32>, vector<24x24xf32> -> vector<24x24xf32>
    %cst_6 = arith.constant dense<0.000000e+00> : vector<24x24xf32>
    %10 = tpu.matmul %9, %5, %cst_6 {dimension_numbers = #tpu.dot_dimension_numbers<[1], [0], [0], [1], [0, 0, 1, 1], [], []>} : vector<24x24xf32>, vector<24x24xf32>, vector<24x24xf32> -> vector<24x24xf32>
    %11 = arith.index_cast %c0_i32 : i32 to index
    %c0_7 = arith.constant 0 : index
    %c0_8 = arith.constant 0 : index
    %c0_9 = arith.constant 0 : index
    %12 = vector.load %arg4[%11, %c0_7, %c0_8, %c0_9] : memref<2x4x24x24xf32, #tpu.memory_space<vmem>>, vector<1x1x24x24xf32>
    %13 = vector.shape_cast %12 : vector<1x1x24x24xf32> to vector<24x24xf32>
    %14 = vector.shape_cast %10 : vector<24x24xf32> to vector<1x1x24x24xf32>
    tpu.vector_store %arg4[%11, %c0_7, %c0_8, %c0_9], %14 {strides = array<i32>} : memref<2x4x24x24xf32, #tpu.memory_space<vmem>>, vector<1x1x24x24xf32>,
    %15 = arith.index_cast %c0_i32 : i32 to index
    %c1 = arith.constant 1 : index
    %c0_10 = arith.constant 0 : index
    %c0_11 = arith.constant 0 : index
    %16 = vector.load %arg1[%15, %c1, %c0_10, %c0_11] : memref<2x4x24x24xf32, #tpu.memory_space<vmem>>, vector<1x1x24x24xf32>
    %17 = vector.shape_cast %16 : vector<1x1x24x24xf32> to vector<24x24xf32>
    %cst_12 = arith.constant dense<0.000000e+00> : vector<24x24xf32>
    %18 = tpu.matmul %2, %17, %cst_12 {dimension_numbers = #tpu.dot_dimension_numbers<[1], [0], [0], [1], [0, 0, 1, 1], [], []>} : vector<24x24xf32>, vector<24x24xf32>, vector<24x24xf32> -> vector<24x24xf32>
    %cst_13 = arith.constant dense<0.000000e+00> : vector<24x24xf32>
    %19 = tpu.matmul %18, %5, %cst_13 {dimension_numbers = #tpu.dot_dimension_numbers<[1], [0], [0], [1], [0, 0, 1, 1], [], []>} : vector<24x24xf32>, vector<24x24xf32>, vector<24x24xf32> -> vector<24x24xf32>
    %20 = arith.index_cast %c0_i32 : i32 to index
    %c1_14 = arith.constant 1 : index
    %c0_15 = arith.constant 0 : index
    %c0_16 = arith.constant 0 : index
    %21 = vector.load %arg4[%20, %c1_14, %c0_15, %c0_16] : memref<2x4x24x24xf32, #tpu.memory_space<vmem>>, vector<1x1x24x24xf32>
    %22 = vector.shape_cast %21 : vector<1x1x24x24xf32> to vector<24x24xf32>
    %23 = vector.shape_cast %19 : vector<24x24xf32> to vector<1x1x24x24xf32>
    tpu.vector_store %arg4[%20, %c1_14, %c0_15, %c0_16], %23 {strides = array<i32>} : memref<2x4x24x24xf32, #tpu.memory_space<vmem>>, vector<1x1x24x24xf32>,
    %24 = arith.index_cast %c0_i32 : i32 to index
    %c2 = arith.constant 2 : index
    %c0_17 = arith.constant 0 : index
    %c0_18 = arith.constant 0 : index
    %25 = vector.load %arg1[%24, %c2, %c0_17, %c0_18] : memref<2x4x24x24xf32, #tpu.memory_space<vmem>>, vector<1x1x24x24xf32>
    %26 = vector.shape_cast %25 : vector<1x1x24x24xf32> to vector<24x24xf32>
    %cst_19 = arith.constant dense<0.000000e+00> : vector<24x24xf32>
    %27 = tpu.matmul %2, %26, %cst_19 {dimension_numbers = #tpu.dot_dimension_numbers<[1], [0], [0], [1], [0, 0, 1, 1], [], []>} : vector<24x24xf32>, vector<24x24xf32>, vector<24x24xf32> -> vector<24x24xf32>
    %cst_20 = arith.constant dense<0.000000e+00> : vector<24x24xf32>
    %28 = tpu.matmul %27, %5, %cst_20 {dimension_numbers = #tpu.dot_dimension_numbers<[1], [0], [0], [1], [0, 0, 1, 1], [], []>} : vector<24x24xf32>, vector<24x24xf32>, vector<24x24xf32> -> vector<24x24xf32>
    %29 = arith.index_cast %c0_i32 : i32 to index
    %c2_21 = arith.constant 2 : index
    %c0_22 = arith.constant 0 : index
    %c0_23 = arith.constant 0 : index
    %30 = vector.load %arg4[%29, %c2_21, %c0_22, %c0_23] : memref<2x4x24x24xf32, #tpu.memory_space<vmem>>, vector<1x1x24x24xf32>
    %31 = vector.shape_cast %30 : vector<1x1x24x24xf32> to vector<24x24xf32>
    %32 = vector.shape_cast %28 : vector<24x24xf32> to vector<1x1x24x24xf32>
    tpu.vector_store %arg4[%29, %c2_21, %c0_22, %c0_23], %32 {strides = array<i32>} : memref<2x4x24x24xf32, #tpu.memory_space<vmem>>, vector<1x1x24x24xf32>,
    %33 = arith.index_cast %c0_i32 : i32 to index
    %c3 = arith.constant 3 : index
    %c0_24 = arith.constant 0 : index
    %c0_25 = arith.constant 0 : index
    %34 = vector.load %arg1[%33, %c3, %c0_24, %c0_25] : memref<2x4x24x24xf32, #tpu.memory_space<vmem>>, vector<1x1x24x24xf32>
    %35 = vector.shape_cast %34 : vector<1x1x24x24xf32> to vector<24x24xf32>
    %cst_26 = arith.constant dense<0.000000e+00> : vector<24x24xf32>
    %36 = tpu.matmul %2, %35, %cst_26 {dimension_numbers = #tpu.dot_dimension_numbers<[1], [0], [0], [1], [0, 0, 1, 1], [], []>} : vector<24x24xf32>, vector<24x24xf32>, vector<24x24xf32> -> vector<24x24xf32>
    %cst_27 = arith.constant dense<0.000000e+00> : vector<24x24xf32>
    %37 = tpu.matmul %36, %5, %cst_27 {dimension_numbers = #tpu.dot_dimension_numbers<[1], [0], [0], [1], [0, 0, 1, 1], [], []>} : vector<24x24xf32>, vector<24x24xf32>, vector<24x24xf32> -> vector<24x24xf32>
    %38 = arith.index_cast %c0_i32 : i32 to index
    %c3_28 = arith.constant 3 : index
    %c0_29 = arith.constant 0 : index
    %c0_30 = arith.constant 0 : index
    %39 = vector.load %arg4[%38, %c3_28, %c0_29, %c0_30] : memref<2x4x24x24xf32, #tpu.memory_space<vmem>>, vector<1x1x24x24xf32>
    %40 = vector.shape_cast %39 : vector<1x1x24x24xf32> to vector<24x24xf32>
    %41 = vector.shape_cast %37 : vector<24x24xf32> to vector<1x1x24x24xf32>
    tpu.vector_store %arg4[%38, %c3_28, %c0_29, %c0_30], %41 {strides = array<i32>} : memref<2x4x24x24xf32, #tpu.memory_space<vmem>>, vector<1x1x24x24xf32>,
    %c1_i32 = arith.constant 1 : i32
    %42 = arith.index_cast %c1_i32 : i32 to index
    %c0_31 = arith.constant 0 : index
    %c0_32 = arith.constant 0 : index
    %43 = vector.load %arg2[%42, %c0_31, %c0_32] : memref<2x24x24xf32, #tpu.memory_space<vmem>>, vector<1x24x24xf32>
    %44 = vector.shape_cast %43 : vector<1x24x24xf32> to vector<24x24xf32>
    %45 = arith.index_cast %c1_i32 : i32 to index
    %c0_33 = arith.constant 0 : index
    %c0_34 = arith.constant 0 : index
    %46 = vector.load %arg3[%45, %c0_33, %c0_34] : memref<2x24x24xf32, #tpu.memory_space<vmem>>, vector<1x24x24xf32>
    %47 = vector.shape_cast %46 : vector<1x24x24xf32> to vector<24x24xf32>
    %48 = arith.index_cast %c1_i32 : i32 to index
    %c0_35 = arith.constant 0 : index
    %c0_36 = arith.constant 0 : index
    %c0_37 = arith.constant 0 : index
    %49 = vector.load %arg1[%48, %c0_35, %c0_36, %c0_37] : memref<2x4x24x24xf32, #tpu.memory_space<vmem>>, vector<1x1x24x24xf32>
    %50 = vector.shape_cast %49 : vector<1x1x24x24xf32> to vector<24x24xf32>
    %cst_38 = arith.constant dense<0.000000e+00> : vector<24x24xf32>
    %51 = tpu.matmul %44, %50, %cst_38 {dimension_numbers = #tpu.dot_dimension_numbers<[1], [0], [0], [1], [0, 0, 1, 1], [], []>} : vector<24x24xf32>, vector<24x24xf32>, vector<24x24xf32> -> vector<24x24xf32>
    %cst_39 = arith.constant dense<0.000000e+00> : vector<24x24xf32>
    %52 = tpu.matmul %51, %47, %cst_39 {dimension_numbers = #tpu.dot_dimension_numbers<[1], [0], [0], [1], [0, 0, 1, 1], [], []>} : vector<24x24xf32>, vector<24x24xf32>, vector<24x24xf32> -> vector<24x24xf32>
    %53 = arith.index_cast %c1_i32 : i32 to index
    %c0_40 = arith.constant 0 : index
    %c0_41 = arith.constant 0 : index
    %c0_42 = arith.constant 0 : index
    %54 = vector.load %arg4[%53, %c0_40, %c0_41, %c0_42] : memref<2x4x24x24xf32, #tpu.memory_space<vmem>>, vector<1x1x24x24xf32>
    %55 = vector.shape_cast %54 : vector<1x1x24x24xf32> to vector<24x24xf32>
    %56 = vector.shape_cast %52 : vector<24x24xf32> to vector<1x1x24x24xf32>
    tpu.vector_store %arg4[%53, %c0_40, %c0_41, %c0_42], %56 {strides = array<i32>} : memref<2x4x24x24xf32, #tpu.memory_space<vmem>>, vector<1x1x24x24xf32>,
    %57 = arith.index_cast %c1_i32 : i32 to index
    %c1_43 = arith.constant 1 : index
    %c0_44 = arith.constant 0 : index
    %c0_45 = arith.constant 0 : index
    %58 = vector.load %arg1[%57, %c1_43, %c0_44, %c0_45] : memref<2x4x24x24xf32, #tpu.memory_space<vmem>>, vector<1x1x24x24xf32>
    %59 = vector.shape_cast %58 : vector<1x1x24x24xf32> to vector<24x24xf32>
    %cst_46 = arith.constant dense<0.000000e+00> : vector<24x24xf32>
    %60 = tpu.matmul %44, %59, %cst_46 {dimension_numbers = #tpu.dot_dimension_numbers<[1], [0], [0], [1], [0, 0, 1, 1], [], []>} : vector<24x24xf32>, vector<24x24xf32>, vector<24x24xf32> -> vector<24x24xf32>
    %cst_47 = arith.constant dense<0.000000e+00> : vector<24x24xf32>
    %61 = tpu.matmul %60, %47, %cst_47 {dimension_numbers = #tpu.dot_dimension_numbers<[1], [0], [0], [1], [0, 0, 1, 1], [], []>} : vector<24x24xf32>, vector<24x24xf32>, vector<24x24xf32> -> vector<24x24xf32>
    %62 = arith.index_cast %c1_i32 : i32 to index
    %c1_48 = arith.constant 1 : index
    %c0_49 = arith.constant 0 : index
    %c0_50 = arith.constant 0 : index
    %63 = vector.load %arg4[%62, %c1_48, %c0_49, %c0_50] : memref<2x4x24x24xf32, #tpu.memory_space<vmem>>, vector<1x1x24x24xf32>
    %64 = vector.shape_cast %63 : vector<1x1x24x24xf32> to vector<24x24xf32>
    %65 = vector.shape_cast %61 : vector<24x24xf32> to vector<1x1x24x24xf32>
    tpu.vector_store %arg4[%62, %c1_48, %c0_49, %c0_50], %65 {strides = array<i32>} : memref<2x4x24x24xf32, #tpu.memory_space<vmem>>, vector<1x1x24x24xf32>,
    %66 = arith.index_cast %c1_i32 : i32 to index
    %c2_51 = arith.constant 2 : index
    %c0_52 = arith.constant 0 : index
    %c0_53 = arith.constant 0 : index
    %67 = vector.load %arg1[%66, %c2_51, %c0_52, %c0_53] : memref<2x4x24x24xf32, #tpu.memory_space<vmem>>, vector<1x1x24x24xf32>
    %68 = vector.shape_cast %67 : vector<1x1x24x24xf32> to vector<24x24xf32>
    %cst_54 = arith.constant dense<0.000000e+00> : vector<24x24xf32>
    %69 = tpu.matmul %44, %68, %cst_54 {dimension_numbers = #tpu.dot_dimension_numbers<[1], [0], [0], [1], [0, 0, 1, 1], [], []>} : vector<24x24xf32>, vector<24x24xf32>, vector<24x24xf32> -> vector<24x24xf32>
    %cst_55 = arith.constant dense<0.000000e+00> : vector<24x24xf32>
    %70 = tpu.matmul %69, %47, %cst_55 {dimension_numbers = #tpu.dot_dimension_numbers<[1], [0], [0], [1], [0, 0, 1, 1], [], []>} : vector<24x24xf32>, vector<24x24xf32>, vector<24x24xf32> -> vector<24x24xf32>
    %71 = arith.index_cast %c1_i32 : i32 to index
    %c2_56 = arith.constant 2 : index
    %c0_57 = arith.constant 0 : index
    %c0_58 = arith.constant 0 : index
    %72 = vector.load %arg4[%71, %c2_56, %c0_57, %c0_58] : memref<2x4x24x24xf32, #tpu.memory_space<vmem>>, vector<1x1x24x24xf32>
    %73 = vector.shape_cast %72 : vector<1x1x24x24xf32> to vector<24x24xf32>
    %74 = vector.shape_cast %70 : vector<24x24xf32> to vector<1x1x24x24xf32>
    tpu.vector_store %arg4[%71, %c2_56, %c0_57, %c0_58], %74 {strides = array<i32>} : memref<2x4x24x24xf32, #tpu.memory_space<vmem>>, vector<1x1x24x24xf32>,
    %75 = arith.index_cast %c1_i32 : i32 to index
    %c3_59 = arith.constant 3 : index
    %c0_60 = arith.constant 0 : index
    %c0_61 = arith.constant 0 : index
    %76 = vector.load %arg1[%75, %c3_59, %c0_60, %c0_61] : memref<2x4x24x24xf32, #tpu.memory_space<vmem>>, vector<1x1x24x24xf32>
    %77 = vector.shape_cast %76 : vector<1x1x24x24xf32> to vector<24x24xf32>
    %cst_62 = arith.constant dense<0.000000e+00> : vector<24x24xf32>
    %78 = tpu.matmul %44, %77, %cst_62 {dimension_numbers = #tpu.dot_dimension_numbers<[1], [0], [0], [1], [0, 0, 1, 1], [], []>} : vector<24x24xf32>, vector<24x24xf32>, vector<24x24xf32> -> vector<24x24xf32>
    %cst_63 = arith.constant dense<0.000000e+00> : vector<24x24xf32>
    %79 = tpu.matmul %78, %47, %cst_63 {dimension_numbers = #tpu.dot_dimension_numbers<[1], [0], [0], [1], [0, 0, 1, 1], [], []>} : vector<24x24xf32>, vector<24x24xf32>, vector<24x24xf32> -> vector<24x24xf32>
    %80 = arith.index_cast %c1_i32 : i32 to index
    %c3_64 = arith.constant 3 : index
    %c0_65 = arith.constant 0 : index
    %c0_66 = arith.constant 0 : index
    %81 = vector.load %arg4[%80, %c3_64, %c0_65, %c0_66] : memref<2x4x24x24xf32, #tpu.memory_space<vmem>>, vector<1x1x24x24xf32>
    %82 = vector.shape_cast %81 : vector<1x1x24x24xf32> to vector<24x24xf32>
    %83 = vector.shape_cast %79 : vector<24x24xf32> to vector<1x1x24x24xf32>
    tpu.vector_store %arg4[%80, %c3_64, %c0_65, %c0_66], %83 {strides = array<i32>} : memref<2x4x24x24xf32, #tpu.memory_space<vmem>>, vector<1x1x24x24xf32>,
    %c2_i32 = arith.constant 2 : i32
    return
  }
  func.func @transform_0(%arg0: i32) -> (i32, i32, i32, i32) {
    %c0_i32 = arith.constant 0 : i32
    %c0_i32_0 = arith.constant 0 : i32
    %c0_i32_1 = arith.constant 0 : i32
    %c0_i32_2 = arith.constant 0 : i32
    return %arg0, %c0_i32, %c0_i32_0, %c0_i32_1 : i32, i32, i32, i32
  }
  func.func @transform_1(%arg0: i32) -> (i32, i32, i32) {
    %c0_i32 = arith.constant 0 : i32
    %c0_i32_0 = arith.constant 0 : i32
    %c0_i32_1 = arith.constant 0 : i32
    return %arg0, %c0_i32, %c0_i32_0 : i32, i32, i32
  }
  func.func @transform_2(%arg0: i32) -> (i32, i32, i32) {
    %c0_i32 = arith.constant 0 : i32
    %c0_i32_0 = arith.constant 0 : i32
    %c0_i32_1 = arith.constant 0 : i32
    return %arg0, %c0_i32, %c0_i32_0 : i32, i32, i32
  }
  func.func @transform_3(%arg0: i32) -> (i32, i32, i32, i32) {
    %c0_i32 = arith.constant 0 : i32
    %c0_i32_0 = arith.constant 0 : i32
    %c0_i32_1 = arith.constant 0 : i32
    %c0_i32_2 = arith.constant 0 : i32
    return %arg0, %c0_i32, %c0_i32_0, %c0_i32_1 : i32, i32, i32, i32
  }
}

</mosaic_0001>

<bundles_post_ra>
// kernel: tpu_custom_call.1
= control target key start
LH: loop header
LB: loop body
LE: loop exit
PB: predicated region body
PF: predicated region fallthrough
CT: control target
= control target key end

     0   :  { %s3113_s0 = inlined_call_operand.hbm [shape: f32[4,4,24,24], index: 0, kind: input, shape index: {}]   ;;  %s3114_s1 = inlined_call_operand.hbm [shape: f32[4,24,24], index: 1, kind: input, shape index: {}]   ;;  %s3115_s2 = inlined_call_operand.hbm [shape: f32[4,24,24], index: 2, kind: input, shape index: {}]   ;;  %s3116_s3 = inlined_call_operand.hbm [shape: f32[4,4,24,24], index: 3, kind: output, shape index: {}]  }
   0x1   :  { %3123 = sst [smem:[#allocation14_spill]] %s3114_s1 }
   0x2   :  { %8 = vsyncpa [#allocation3], 0 }
   0x3   :  { %10 = vsyncpa [#allocation3 + $0x1], 0 }
   0x4   :  { %11 = vsyncpa [#allocation6], 0 }
   0x5   :  { %13 = vsyncpa [#allocation6 + $0x1], 0 }
   0x6   :  { %14 = vsyncpa [#allocation4], 0 }
   0x7   :  { %16 = vsyncpa [#allocation4 + $0x1], 0  ;;  %s2556_s12 = smov 0   ;;  %s2558_s13 = smov 0  }
   0x8   :  { %s2560_s14 = smov 0   ;;  %s2562_s15 = smov 0  }
   0x9 LB: > { %3124 = sst [smem:[#allocation12_spill]] %s2520_s14  ;;  %s2577_s16 = sadd.s32 4294967295, %s2524_s15   ;;  %s2524_s15 = sphi %s2562_s15, %s3144_s15   ;;  %s2520_s14 = sphi %s2560_s14, %s3141_s14   ;;  %s2516_s13 = sphi %s2558_s13, %s3143_s13   ;;  %s2512_s12 = sphi %s2556_s12, %s3142_s12  }
   0xa   : > { %s1851_s17 = sadd.s32 4294967294, %s2524_s15   ;;  %s2581_s18 = sadd.s32 1, %s2524_s15  }
   0xb   : > { %s29_s19 = sadd.s32 1, %s2520_s14  ;;  %s26_s20 = ssub.s32 %s2524_s15, %s2581_s18 }
   0xc   : > { %p36_p0 = scmp.ne.s32.totalorder %s2520_s14, %s2516_s13  ;;  %p27_p1 = scmp.eq.s32.totalorder %s26_s20, 0 }
   0xd   : > { %p37_p2 = scmp.eq.s32.totalorder %s2524_s15, 0  ;;  %p42_p3 = scmp.ne.s32.totalorder %s2516_s13, %s2512_s12 }
   0xe   : > { %p43_p4 = scmp.eq.s32.totalorder %s2577_s16, 0  ;;  %p118_p7 = scmp.eq.s32.totalorder %s2577_s16, 1 }
   0xf   : > { %s2593_s21 = scalar_select %p27_p1, %s2520_s14, %s29_s19  }
  0x10   : > { %p38_p5 = por %p37_p2, %p36_p0  ;;  %p2595_p6 = por %p43_p4, %p42_p3 }
  0x11   : > { %3125 = sst [smem:[#allocation13_spill]] %s2593_s21  ;;  %p124_p8 = scmp.eq.s32.totalorder %s1851_s17, 1 }
  0x12   : > { %s3126_s22 = scalar_select %p2595_p6, 1, 0 }
  0x13   : > { %p2332_p10 = scmp.lt.s32.totalorder %s2524_s15, 2  ;;  %p2602_p11 = por %p118_p7, %p36_p0 }
  0x14   : > { %p2606_p12 = por %p124_p8, %p42_p3  ;;  %s2611_s25 = sand.u32 1, %s2520_s14  }
  0x15   : > { %s3127_s23 = scalar_select %p2602_p11, 1, 0 }
  0x16   : > { %s3128_s24 = scalar_select %p2606_p12, 1, 0 }
  0x17   : > { %p2613_p13 = pnand %p2332_p10, %p38_p5  ;;  %s166_s27 = sand.u32 1, %s2524_s15  }
  0x18   : > { %s3119_s28 = smul.u32 48, %s2611_s25  ;;  %p1863_p0 = scmp.ge.s32.totalorder %s2524_s15, 1 }
  0x19   : > { %s2304_s29 = smul.u32 768, %s2524_s15  ;;  %p208_p1 = scmp.lt.s32.totalorder %s2524_s15, 3 }
  0x1a   : > { %s3130_s1 = sld [smem:[#allocation14_spill]]  ;;  %s170_s6 = scalar_lea.vmem [#allocation5], %s3119_s28 }
  0x1b   : > { %s178_s7 = sshll.u32 %s170_s6, 4  ;;  %p2633_p2 = pnand %p1863_p0, %p208_p1  ;;  %s2631_s7 = int_to_ptr.vmem [resolvable:$true] %s178_s7 }
  0x1c   : > { %s2637_s9 = scalar_lea.sflag [#allocation6], %s166_s27  ;;  %p2643_p4 = pneg %p2613_p13 }
  0x1d   : > { %s3131_s8 = scalar_select %p2633_p2, 1, 0 }
  0x20   : > { %s2627_s5 = scalar_lea.hbm %s3130_s1, %s2304_s29  ;;  %s2377_s20 = scalar_lea.hbm %s3130_s1, 1536 }
  0x21   : > { %s2372_s10 = scalar_lea.hbm %s2627_s5, 768  ;;  %p2378_p8 = scmp.lt.s32.totalorder %s2627_s5, %s3130_s1 }
  0x22   : > { %p2373_p3 = scmp.ne.s32.totalorder %s2627_s5, %s2372_s10  ;;  %p2379_p10 = scmp.lt.s32.totalorder %s2377_s20, %s2372_s10 }
  0x24   : > { %p2375_p5 = pnand %p2643_p4, %p2373_p3  ;;  %p2380_p0 = por %p2379_p10, %p2378_p8 }
  0x26   : > { %p2376_p7 = pneg %p2375_p5 }
  0x28   : > { %p2381_p1 = pnand %p2380_p0, %p2376_p7 }
  0x2a   : > { %2384 = shalt.err (!%p2381_p1)
}
  0x2b   : > { %s2385_s27 = scalar_lea.vmem %s2631_s7, 768  ;;  %s2526_s6 = smov [#allocation5]  }
  0x2c   : > { %p2386_p9 = scmp.ne.s32.totalorder %s2631_s7, %s2385_s27  ;;  %s2390_s17 = sshll.u32 %s2526_s6, 4  ;;  %s2391_s17 = int_to_ptr.vmem [resolvable:$false] %s2390_s17 }
  0x2d   : > { %s2392_s19 = scalar_lea.vmem %s2391_s17, 1536  ;;  %p2393_p12 = scmp.lt.s32.totalorder %s2631_s7, %s2391_s17 }
  0x2e   : > { %p2388_p3 = pnand %p2386_p9, %p2643_p4  ;;  %p2394_p11 = scmp.lt.s32.totalorder %s2392_s19, %s2385_s27 }
  0x30   : > { %p2389_p5 = pneg %p2388_p3  ;;  %p2395_p6 = por %p2394_p11, %p2393_p12 }
  0x32   : > { %p2396_p2 = pnand %p2395_p6, %p2389_p5 }
  0x34   : > { %2399 = shalt.err (!%p2396_p2)
}
  0x35   : > { %s3121_s10 = smov 128   ;;  %s2528_s20 = smov 8  }
  0x36   : > { %2324 = dma.hbm_to_vmem [thread:$0]  (!%p2613_p13), %s2627_s5, 768, %s2631_s7, %s2637_s9, %s3121_s10, %s3121_s10, %s2528_s20  }
  0x37   : > { %s2301_s30 = smul.u32 192, %s2611_s25  ;;  %s2676_s17 = scalar_lea.hbm %s3115_s2, %s2304_s29 }
  0x38   : > { %s2302_s4 = smul.u32 3072, %s2524_s15  ;;  %s145_s27 = scalar_lea.sflag [#allocation3], %s2611_s25 }
  0x39   : > { %s148_s21 = scalar_lea.vmem [#allocation2], %s2301_s30  ;;  %s3133_s5 = smul.u32 48, %s2611_s25 }
  0x3a   : > { %s2681_s1 = scalar_lea.hbm %s3113_s0, %s2302_s4  ;;  %s156_s14 = sshll.u32 %s148_s21, 4  ;;  %s2683_s14 = int_to_ptr.vmem [resolvable:$true] %s156_s14 }
  0x3b   : > { %s2687_s7 = scalar_lea.vmem [#allocation7], %s3133_s5  ;;  %s2400_s29 = scalar_lea.hbm %s2681_s1, 3072 }
  0x3c   : > { %s200_s10 = sshll.u32 %s2687_s7, 4  ;;  %p2401_p6 = scmp.ne.s32.totalorder %s2681_s1, %s2400_s29  ;;  %s201_s10 = int_to_ptr.vmem [resolvable:$true] %s200_s10 }
  0x3d   : > { %s2405_s6 = scalar_lea.hbm %s3113_s0, 6144  ;;  %p2406_p12 = scmp.lt.s32.totalorder %s2681_s1, %s3113_s0 }
  0x3e   : > { %p2403_p9 = pnand %p2401_p6, %p2643_p4  ;;  %p2407_p2 = scmp.lt.s32.totalorder %s2405_s6, %s2400_s29 }
  0x40   : > { %p2404_p11 = pneg %p2403_p9  ;;  %p2408_p7 = por %p2407_p2, %p2406_p12 }
  0x42   : > { %p2409_p8 = pnand %p2408_p7, %p2404_p11 }
  0x44   : > { %2412 = shalt.err (!%p2409_p8)
}
  0x45   : > { %s2413_s21 = scalar_lea.vmem %s2683_s14, 3072  ;;  %s2529_s25 = smov [#allocation2]  }
  0x46   : > { %p2414_p10 = scmp.ne.s32.totalorder %s2683_s14, %s2413_s21  ;;  %s2418_s5 = sshll.u32 %s2529_s25, 4  ;;  %s2419_s5 = int_to_ptr.vmem [resolvable:$false] %s2418_s5 }
  0x47   : > { %s2420_s28 = scalar_lea.vmem %s2419_s5, 6144  ;;  %p2421_p3 = scmp.lt.s32.totalorder %s2683_s14, %s2419_s5 }
  0x48   : > { %p2416_p0 = pnand %p2414_p10, %p2643_p4  ;;  %p2422_p5 = scmp.lt.s32.totalorder %s2420_s28, %s2413_s21 }
  0x4a   : > { %p2417_p1 = pneg %p2416_p0  ;;  %p2423_p6 = por %p2422_p5, %p2421_p3 }
  0x4c   : > { %p2424_p9 = pnand %p2423_p6, %p2417_p1 }
  0x4e   : > { %2427 = shalt.err (!%p2424_p9)
}
  0x4f   : > { %s3134_s29 = smov 128   ;;  %s2428_s4 = scalar_lea.hbm %s2676_s17, 768 }
  0x50   : > { %2321 = dma.hbm_to_vmem [thread:$0]  (!%p2613_p13), %s2681_s1, 3072, %s2683_s14, %s145_s27, %s3134_s29, %s3134_s29, %s2528_s20  }
  0x51   : > { %p2429_p11 = scmp.ne.s32.totalorder %s2676_s17, %s2428_s4  ;;  %s2433_s30 = scalar_lea.hbm %s3115_s2, 1536 }
  0x52   : > { %p2434_p7 = scmp.lt.s32.totalorder %s2676_s17, %s3115_s2  ;;  %p2435_p8 = scmp.lt.s32.totalorder %s2433_s30, %s2428_s4 }
  0x53   : > { %p2431_p12 = pnand %p2429_p11, %p2643_p4 }
  0x54   : > { %p2436_p10 = por %p2435_p8, %p2434_p7 }
  0x55   : > { %p2432_p2 = pneg %p2431_p12 }
  0x57   : > { %p2437_p0 = pnand %p2436_p10, %p2432_p2 }
  0x59   : > { %2440 = shalt.err (!%p2437_p0)
}
  0x5a   : > { %s2441_s1 = scalar_lea.vmem %s201_s10, 768  ;;  %s2530_s14 = smov [#allocation7]  }
  0x5b   : > { %p2442_p1 = scmp.ne.s32.totalorder %s201_s10, %s2441_s1  ;;  %s2446_s7 = sshll.u32 %s2530_s14, 4  ;;  %s2447_s7 = int_to_ptr.vmem [resolvable:$false] %s2446_s7 }
  0x5c   : > { %s2448_s27 = scalar_lea.vmem %s2447_s7, 1536  ;;  %p2449_p6 = scmp.lt.s32.totalorder %s201_s10, %s2447_s7 }
  0x5d   : > { %p2444_p3 = pnand %p2442_p1, %p2643_p4  ;;  %p2450_p9 = scmp.lt.s32.totalorder %s2448_s27, %s2441_s1 }
  0x5f   : > { %p2445_p5 = pneg %p2444_p3  ;;  %p2451_p11 = por %p2450_p9, %p2449_p6 }
  0x61   : > { %p2452_p12 = pnand %p2451_p11, %p2445_p5 }
  0x63   : > { %2455 = shalt.err (!%p2452_p12)
}
  0x64   : > { %2327 = dma.hbm_to_vmem [thread:$0]  (!%p2613_p13), %s2676_s17, 768, %s201_s10, %s2637_s9, %s3134_s29, %s3134_s29, %s2528_s20  }
  0x65   : > { %p3135_p4 = scmp.ne.s32.totalorder %s3131_s8, 0 }
  0x66   : > { %s2739_s11 = sand.u32 (!%p3135_p4), 1, %s2516_s13   ;;  %p3136_p2 = scmp.ne.s32.totalorder (!%p3135_p4), %s3126_s22, 0 }
  0x67   : > { %212 = sbr.rel (%p3135_p4) target bundleno = 614 (0x266), region = 32  ;;  %s215_s28 = scalar_lea.sflag (!%p3135_p4), [#allocation3], %s2739_s11 }
  0x68   : > { %s2307_s5 = smul.u32 (!%p3135_p4), 192, %s2739_s11 }
  0x6a   : > { %s2745_s26 = scalar_lea.vmem (!%p3135_p4), [#allocation2], %s2307_s5 }
  0x6c   : > { %2499 = dma.done.wait (%p3136_p2), %s215_s28, 3072  }
  0x6d   : > { %2501 = vsyncadd (%p3136_p2), %s215_s28, 4294964224  ;;  %s223_s8 = sand.u32 1, %s2577_s16   ;;  %s2308_s9 = smul.u32 48, %s2739_s11 }
  0x6e   : > { %s224_s10 = scalar_lea.sflag [#allocation6], %s223_s8 }
  0x6f   : > { %s2755_s20 = scalar_lea.vmem [#allocation5], %s2308_s9 }
  0x70   : > { %2503 = dma.done.wait (%p3136_p2), %s224_s10, 1536  }
  0x71   : > { %2505 = vsyncadd (%p3136_p2), %s224_s10, 4294965760  ;;  %v2531_v0 = vmov 0.0   ;;  %vm2532_vm0 = vmmov 0   ;;  %v281_v1 = vld [vmem:[%s2745_s26 + $0x10] sm:$0xff]  ;;  %v280_v2 = vld [vmem:[%s2745_s26 + $0x8] sm:$0xff]  ;;  %vm282_vm1 = vcmask 195584  }
  0x72   : > { %2061 = vmatprep.subr.mxu0 %v2531_v0  ;;  %2067 = vmatprep.mubr.msk.f32.mxu0 %vm2532_vm0, %v2531_v0  ;;  %v279_v3 = vld [vmem:[%s2745_s26] sm:$0xff]  ;;  %v1872_v5 = vld [vmem:[%s2745_s26 + $0x28] sm:$0xff]  ;;  %v1870_v8 = vld [vmem:[%s2745_s26 + $0x18] sm:$0xff]  ;;  %s2786_s22 = scalar_lea.vmem [#allocation7], %s2308_s9  ;;  %s3013_s17 = scalar_lea.vmem [#allocation8], %s2307_s5 }
  0x73   : > { %2076 = vmatprep.subr.mxu1 %v2531_v0  ;;  %2082 = vmatprep.mubr.msk.f32.mxu1 %vm2532_vm0, %v2531_v0  ;;  %v273_v4 = vld [vmem:[%s2755_s20] sm:$0xff]  ;;  %v274_v7 = vld [vmem:[%s2755_s20 + $0x8] sm:$0xff]  ;;  %v2789_v9 = vld [vmem:[%s2786_s22 + $0x10] sm:$0xff]  ;;  %s2309_s29 = smul.u32 3072, %s2577_s16  ;;  %s1735_s4 = sshll.u32 %s3013_s17, 4  ;;  %s3068_s4 = int_to_ptr.vmem [resolvable:$true] %s1735_s4 }
  0x74   : > { %2062 = vmatpush3.msra.mxu0 %v281_v1  ;;  %v1871_v6 = vld [vmem:[%s2745_s26 + $0x20] sm:$0xff]  ;;  %v2795_v11 = vld [vmem:[%s2786_s22 + $0x8] sm:$0xff]  ;;  %2077 = vmatpush3.msra.mxu1 %v2789_v9  ;;  %v1882_v14 = vld [vmem:[%s2745_s26 + $0x30] sm:$0xff]  ;;  %s1721_s16 = scalar_lea.sflag [#allocation4], %s2739_s11  ;;  %s2456_s21 = scalar_lea.vmem %s3068_s4, 3072 }
  0x75   : > { %2063 = vmatprep.subr.mxu0 %v2531_v0  ;;  %v275_v10 = vld [vmem:[%s2755_s20 + $0x10] sm:$0xff]  ;;  %2078 = vmatprep.subr.mxu1 %v2531_v0  ;;  %v1883_v13 = vld [vmem:[%s2745_s26 + $0x38] sm:$0xff]  ;;  %v1894_v17 = vld [vmem:[%s2745_s26 + $0x48] sm:$0xff]  ;;  %s3066_s30 = scalar_lea.hbm %s3116_s3, %s2309_s29  ;;  %p2457_p13 = scmp.ne.s32.totalorder %s3068_s4, %s2456_s21 }
  0x76   : > { %2064 = vmatpush3.msra.mxu0 %v280_v2  ;;  %2079 = vmatpush3.msra.mxu1 %v2795_v11  ;;  %v1884_v12 = vld [vmem:[%s2745_s26 + $0x40] sm:$0xff]  ;;  %v1896_v15 = vld [vmem:[%s2745_s26 + $0x58] sm:$0xff]  ;;  %v1895_v16 = vld [vmem:[%s2745_s26 + $0x50] sm:$0xff]  ;;  %p3137_p7 = scmp.ne.s32.totalorder %s3127_s23, 0  ;;  %s2533_s25 = smov [#allocation8]  }
  0x77   : > { %2065 = vmatprep.subr.mxu0 %v2531_v0  ;;  %2080 = vmatprep.subr.mxu1 %v2531_v0  ;;  %v1914_v18 = vld [vmem:[%s2745_s26 + $0x70] sm:$0xff]  ;;  %v1913_v19 = vld [vmem:[%s2745_s26 + $0x68] sm:$0xff]  ;;  %v1912_v20 = vld [vmem:[%s2745_s26 + $0x60] sm:$0xff]  ;;  %s2460_s1 = sshll.u32 %s2533_s25, 4  ;;  %s2461_s1 = int_to_ptr.vmem [resolvable:$false] %s2460_s1 }
  0x78   : > { %2066 = vmatpush3.msra.mxu0 %v279_v3  ;;  %v1906_v21 = vld [vmem:[%s2755_s20 + $0x18] sm:$0xff]  ;;  %v1925_v23 = vld [vmem:[%s2745_s26 + $0x80] sm:$0xff]  ;;  %v1908_v26 = vld [vmem:[%s2755_s20 + $0x28] sm:$0xff]  ;;  %p2458_p8 = pnand %p2457_p13, %p3137_p7  ;;  %s2462_s14 = scalar_lea.vmem %s2461_s1, 6144 }
  0x79   : > { %2068 = vmatmul.mubr.msk.f32.vlgmr.msra.gmra.mxu0 %vm282_vm1, %v273_v4  ;;  %2091 = vmatprep.subr.mxu0 %v2531_v0  ;;  %v1926_v22 = vld [vmem:[%s2745_s26 + $0x88] sm:$0xff]  ;;  %v1907_v24 = vld [vmem:[%s2755_s20 + $0x20] sm:$0xff]  ;;  %v1924_v25 = vld [vmem:[%s2745_s26 + $0x78] sm:$0xff]  ;;  %p2463_p0 = scmp.lt.s32.totalorder %s3068_s4, %s2461_s1  ;;  %p2464_p1 = scmp.lt.s32.totalorder %s2462_s14, %s2456_s21 }
  0x7a   : > { %2092 = vmatpush3.msra.mxu0 %v1872_v5  ;;  %2070 = vmatprep.mubr.msk.f32.mxu0 %vm2532_vm0, %v2531_v0  ;;  %v1938_v27 = vld [vmem:[%s2745_s26 + $0xa0] sm:$0xff]  ;;  %v1937_v28 = vld [vmem:[%s2745_s26 + $0x98] sm:$0xff]  ;;  %v1936_v29 = vld [vmem:[%s2745_s26 + $0x90] sm:$0xff]  ;;  %p2459_p10 = pneg %p2458_p8 }
  0x7b   : > { %2093 = vmatprep.subr.mxu0 %v2531_v0  ;;  %v2876_v30 = vld [vmem:[%s2786_s22] sm:$0xff]  ;;  %v1950_v31 = vld [vmem:[%s2745_s26 + $0xb8] sm:$0xff]  ;;  %v1948_v33 = vld [vmem:[%s2745_s26 + $0xa8] sm:$0xff]  ;;  %p2465_p3 = por %p2464_p1, %p2463_p0 }
  0x7c   : > { %2094 = vmatpush3.msra.mxu0 %v1871_v6  ;;  %2081 = vmatpush3.msra.mxu1 %v2876_v30  ;;  %v1949_v32 = vld [vmem:[%s2745_s26 + $0xb0] sm:$0xff]  ;;  %v1911_v52 = vld [vmem:[%s2786_s22 + $0x28] sm:$0xff]  ;;  %v1909_v56 = vld [vmem:[%s2786_s22 + $0x18] sm:$0xff] }
  0x7d   : > { %2071 = vmatmul.mubr.msk.f32.gmra.mxu0 %vm282_vm1, %v274_v7  ;;  %2095 = vmatprep.subr.mxu0 %v2531_v0  ;;  %v1910_v54 = vld [vmem:[%s2786_s22 + $0x20] sm:$0xff]  ;;  %p2466_p5 = pnand %p2465_p3, %p2459_p10 }
  0x7e   : > { %2073 = vmatprep.mubr.msk.f32.mxu0 %vm2532_vm0, %v2531_v0  ;;  %2096 = vmatpush3.msra.mxu0 %v1870_v8 }
  0x7f   : > { %2121 = vmatprep.subr.mxu0 %v2531_v0  ;;  %2106 = vmatprep.subr.mxu1 %v2531_v0 }
  0x81   : > { %2074 = vmatmul.mubr.msk.f32.gmra.mxu0 %vm282_vm1, %v275_v10 }
  0x82   : > { %2097 = vmatprep.mubr.msk.f32.mxu0 %vm2532_vm0, %v2531_v0 }
  0x85   : > { %2098 = vmatmul.mubr.msk.f32.vlgmr.msra.gmra.mxu0 %vm282_vm1, %v273_v4 }
  0x86   : > { %2122 = vmatpush3.msra.mxu0 %v1884_v12  ;;  %2100 = vmatprep.mubr.msk.f32.mxu0 %vm2532_vm0, %v2531_v0 }
  0x87   : > { %2123 = vmatprep.subr.mxu0 %v2531_v0 }
  0x88   : > { %2124 = vmatpush3.msra.mxu0 %v1883_v13 }
  0x89   : > { %2101 = vmatmul.mubr.msk.f32.gmra.mxu0 %vm282_vm1, %v274_v7  ;;  %2125 = vmatprep.subr.mxu0 %v2531_v0 }
  0x8a   : > { %2103 = vmatprep.mubr.msk.f32.mxu0 %vm2532_vm0, %v2531_v0  ;;  %2126 = vmatpush3.msra.mxu0 %v1882_v14 }
  0x8b   : > { %2151 = vmatprep.subr.mxu0 %v2531_v0 }
  0x8d   : > { %2104 = vmatmul.mubr.msk.f32.gmra.mxu0 %vm282_vm1, %v275_v10 }
  0x8e   : > { %2127 = vmatprep.mubr.msk.f32.mxu0 %vm2532_vm0, %v2531_v0 }
  0x91   : > { %2128 = vmatmul.mubr.msk.f32.vlgmr.msra.gmra.mxu0 %vm282_vm1, %v273_v4 }
  0x92   : > { %2152 = vmatpush3.msra.mxu0 %v1896_v15  ;;  %2130 = vmatprep.mubr.msk.f32.mxu0 %vm2532_vm0, %v2531_v0 }
  0x93   : > { %2153 = vmatprep.subr.mxu0 %v2531_v0 }
  0x94   : > { %2154 = vmatpush3.msra.mxu0 %v1895_v16 }
  0x95   : > { %2131 = vmatmul.mubr.msk.f32.gmra.mxu0 %vm282_vm1, %v274_v7  ;;  %2155 = vmatprep.subr.mxu0 %v2531_v0 }
  0x96   : > { %2133 = vmatprep.mubr.msk.f32.mxu0 %vm2532_vm0, %v2531_v0  ;;  %2156 = vmatpush3.msra.mxu0 %v1894_v17 }
  0x97   : > { %2181 = vmatprep.subr.mxu0 %v2531_v0 }
  0x99   : > { %2134 = vmatmul.mubr.msk.f32.gmra.mxu0 %vm282_vm1, %v275_v10 }
  0x9a   : > { %2157 = vmatprep.mubr.msk.f32.mxu0 %vm2532_vm0, %v2531_v0 }
  0x9d   : > { %2158 = vmatmul.mubr.msk.f32.vlgmr.msra.gmra.mxu0 %vm282_vm1, %v273_v4 }
  0x9e   : > { %2182 = vmatpush3.msra.mxu0 %v1914_v18  ;;  %2160 = vmatprep.mubr.msk.f32.mxu0 %vm2532_vm0, %v2531_v0 }
  0x9f   : > { %2183 = vmatprep.subr.mxu0 %v2531_v0 }
  0xa0   : > { %2184 = vmatpush3.msra.mxu0 %v1913_v19 }
  0xa1   : > { %2161 = vmatmul.mubr.msk.f32.gmra.mxu0 %vm282_vm1, %v274_v7  ;;  %2185 = vmatprep.subr.mxu0 %v2531_v0 }
  0xa2   : > { %2163 = vmatprep.mubr.msk.f32.mxu0 %vm2532_vm0, %v2531_v0  ;;  %2186 = vmatpush3.msra.mxu0 %v1912_v20 }
  0xa3   : > { %2211 = vmatprep.subr.mxu0 %v2531_v0 }
  0xa5   : > { %2164 = vmatmul.mubr.msk.f32.gmra.mxu0 %vm282_vm1, %v275_v10 }
  0xa6   : > { %2187 = vmatprep.mubr.msk.f32.mxu0 %vm2532_vm0, %v2531_v0 }
  0xa9   : > { %2188 = vmatmul.mubr.msk.f32.vlgmr.msra.gmra.mxu0 %vm282_vm1, %v1906_v21 }
  0xaa   : > { %2212 = vmatpush3.msra.mxu0 %v1926_v22  ;;  %2190 = vmatprep.mubr.msk.f32.mxu0 %vm2532_vm0, %v2531_v0 }
  0xab   : > { %2213 = vmatprep.subr.mxu0 %v2531_v0 }
  0xac   : > { %2214 = vmatpush3.msra.mxu0 %v1925_v23 }
  0xad   : > { %2191 = vmatmul.mubr.msk.f32.gmra.mxu0 %vm282_vm1, %v1907_v24  ;;  %2215 = vmatprep.subr.mxu0 %v2531_v0 }
  0xae   : > { %2193 = vmatprep.mubr.msk.f32.mxu0 %vm2532_vm0, %v2531_v0  ;;  %2216 = vmatpush3.msra.mxu0 %v1924_v25 }
  0xaf   : > { %2241 = vmatprep.subr.mxu0 %v2531_v0 }
  0xb1   : > { %2194 = vmatmul.mubr.msk.f32.gmra.mxu0 %vm282_vm1, %v1908_v26 }
  0xb2   : > { %2217 = vmatprep.mubr.msk.f32.mxu0 %vm2532_vm0, %v2531_v0 }
  0xb5   : > { %2218 = vmatmul.mubr.msk.f32.vlgmr.msra.gmra.mxu0 %vm282_vm1, %v1906_v21 }
  0xb6   : > { %2242 = vmatpush3.msra.mxu0 %v1938_v27  ;;  %2220 = vmatprep.mubr.msk.f32.mxu0 %vm2532_vm0, %v2531_v0 }
  0xb7   : > { %2243 = vmatprep.subr.mxu0 %v2531_v0 }
  0xb8   : > { %2244 = vmatpush3.msra.mxu0 %v1937_v28 }
  0xb9   : > { %2221 = vmatmul.mubr.msk.f32.gmra.mxu0 %vm282_vm1, %v1907_v24  ;;  %2245 = vmatprep.subr.mxu0 %v2531_v0 }
  0xba   : > { %2223 = vmatprep.mubr.msk.f32.mxu0 %vm2532_vm0, %v2531_v0  ;;  %2246 = vmatpush3.msra.mxu0 %v1936_v29 }
  0xbb   : > { %2271 = vmatprep.subr.mxu0 %v2531_v0 }
  0xbd   : > { %2224 = vmatmul.mubr.msk.f32.gmra.mxu0 %vm282_vm1, %v1908_v26 }
  0xbe   : > { %2247 = vmatprep.mubr.msk.f32.mxu0 %vm2532_vm0, %v2531_v0 }
  0xc1   : > { %2248 = vmatmul.mubr.msk.f32.vlgmr.msra.gmra.mxu0 %vm282_vm1, %v1906_v21 }
  0xc2   : > { %2272 = vmatpush3.msra.mxu0 %v1950_v31  ;;  %2250 = vmatprep.mubr.msk.f32.mxu0 %vm2532_vm0, %v2531_v0 }
  0xc3   : > { %2273 = vmatprep.subr.mxu0 %v2531_v0 }
  0xc4   : > { %2274 = vmatpush3.msra.mxu0 %v1949_v32 }
  0xc5   : > { %2251 = vmatmul.mubr.msk.f32.gmra.mxu0 %vm282_vm1, %v1907_v24  ;;  %2275 = vmatprep.subr.mxu0 %v2531_v0 }
  0xc6   : > { %2253 = vmatprep.mubr.msk.f32.mxu0 %vm2532_vm0, %v2531_v0  ;;  %2276 = vmatpush3.msra.mxu0 %v1948_v33 }
  0xc9   : > { %2254 = vmatmul.mubr.msk.f32.gmra.mxu0 %vm282_vm1, %v1908_v26 }
  0xca   : > { %2277 = vmatprep.mubr.msk.f32.mxu0 %vm2532_vm0, %v2531_v0 }
  0xcd   : > { %2278 = vmatmul.mubr.msk.f32.vlgmr.msra.gmra.mxu0 %vm282_vm1, %v1906_v21 }
  0xce   : > { %2280 = vmatprep.mubr.msk.f32.mxu0 %vm2532_vm0, %v2531_v0 }
  0xd1   : > { %2281 = vmatmul.mubr.msk.f32.gmra.mxu0 %vm282_vm1, %v1907_v24 }
  0xd2   : > { %2283 = vmatprep.mubr.msk.f32.mxu0 %vm2532_vm0, %v2531_v0 }
  0xd5   : > { %2284 = vmatmul.mubr.msk.f32.gmra.mxu0 %vm282_vm1, %v1908_v26 }
 0x139   : > { %v358_v34 = vpop.f32.mrf.mxu0 }
 0x13a   : > { %2083 = vmatmul.mubr.msk.f32.vlgmr.msra.gmra.mxu1 %vm282_vm1, %v358_v34 }
 0x13b   : > { %v2069_v35 = vpop.f32.mrf.mxu0  ;;  %2107 = vmatpush3.msra.mxu1 %v2789_v9  ;;  %2085 = vmatprep.mubr.msk.f32.mxu1 %vm2532_vm0, %v2531_v0 }
 0x13c   : > { %2108 = vmatprep.subr.mxu1 %v2531_v0 }
 0x13d   : > { %v363_v36 = vpop.f32.mrf.mxu0  ;;  %2109 = vmatpush3.msra.mxu1 %v2795_v11 }
 0x13e   : > { %2086 = vmatmul.mubr.msk.f32.gmra.mxu1 %vm282_vm1, %v363_v36  ;;  %2110 = vmatprep.subr.mxu1 %v2531_v0 }
 0x13f   : > { %v2072_v37 = vpop.f32.mrf.mxu0  ;;  %2088 = vmatprep.mubr.msk.f32.mxu1 %vm2532_vm0, %v2531_v0  ;;  %2111 = vmatpush3.msra.mxu1 %v2876_v30 }
 0x140   : > { %2136 = vmatprep.subr.mxu1 %v2531_v0 }
 0x141   : > { %v368_v38 = vpop.f32.mrf.mxu0 }
 0x142   : > { %2089 = vmatmul.mubr.msk.f32.gmra.mxu1 %vm282_vm1, %v368_v38 }
 0x143   : > { %v2075_v39 = vpop.f32.mrf.mxu0  ;;  %2112 = vmatprep.mubr.msk.f32.mxu1 %vm2532_vm0, %v2531_v0 }
 0x145   : > { %v534_v40 = vpop.f32.mrf.mxu0 }
 0x146   : > { %2113 = vmatmul.mubr.msk.f32.vlgmr.msra.gmra.mxu1 %vm282_vm1, %v534_v40 }
 0x147   : > { %v2099_v41 = vpop.f32.mrf.mxu0  ;;  %2137 = vmatpush3.msra.mxu1 %v2789_v9  ;;  %2115 = vmatprep.mubr.msk.f32.mxu1 %vm2532_vm0, %v2531_v0 }
 0x148   : > { %2138 = vmatprep.subr.mxu1 %v2531_v0 }
 0x149   : > { %v539_v42 = vpop.f32.mrf.mxu0  ;;  %2139 = vmatpush3.msra.mxu1 %v2795_v11 }
 0x14a   : > { %2116 = vmatmul.mubr.msk.f32.gmra.mxu1 %vm282_vm1, %v539_v42  ;;  %2140 = vmatprep.subr.mxu1 %v2531_v0 }
 0x14b   : > { %v2102_v43 = vpop.f32.mrf.mxu0  ;;  %2118 = vmatprep.mubr.msk.f32.mxu1 %vm2532_vm0, %v2531_v0  ;;  %2141 = vmatpush3.msra.mxu1 %v2876_v30 }
 0x14c   : > { %2166 = vmatprep.subr.mxu1 %v2531_v0 }
 0x14d   : > { %v544_v44 = vpop.f32.mrf.mxu0 }
 0x14e   : > { %2119 = vmatmul.mubr.msk.f32.gmra.mxu1 %vm282_vm1, %v544_v44 }
 0x14f   : > { %v2105_v45 = vpop.f32.mrf.mxu0  ;;  %2142 = vmatprep.mubr.msk.f32.mxu1 %vm2532_vm0, %v2531_v0 }
 0x151   : > { %v711_v46 = vpop.f32.mrf.mxu0 }
 0x152   : > { %2143 = vmatmul.mubr.msk.f32.vlgmr.msra.gmra.mxu1 %vm282_vm1, %v711_v46 }
 0x153   : > { %v2129_v47 = vpop.f32.mrf.mxu0  ;;  %2167 = vmatpush3.msra.mxu1 %v2789_v9  ;;  %2145 = vmatprep.mubr.msk.f32.mxu1 %vm2532_vm0, %v2531_v0 }
 0x154   : > { %2168 = vmatprep.subr.mxu1 %v2531_v0 }
 0x155   : > { %v716_v48 = vpop.f32.mrf.mxu0  ;;  %2169 = vmatpush3.msra.mxu1 %v2795_v11 }
 0x156   : > { %2146 = vmatmul.mubr.msk.f32.gmra.mxu1 %vm282_vm1, %v716_v48  ;;  %2170 = vmatprep.subr.mxu1 %v2531_v0 }
 0x157   : > { %v2132_v49 = vpop.f32.mrf.mxu0  ;;  %2148 = vmatprep.mubr.msk.f32.mxu1 %vm2532_vm0, %v2531_v0  ;;  %2171 = vmatpush3.msra.mxu1 %v2876_v30 }
 0x158   : > { %2196 = vmatprep.subr.mxu1 %v2531_v0 }
 0x159   : > { %v721_v50 = vpop.f32.mrf.mxu0 }
 0x15a   : > { %2149 = vmatmul.mubr.msk.f32.gmra.mxu1 %vm282_vm1, %v721_v50 }
 0x15b   : > { %v2135_v51 = vpop.f32.mrf.mxu0  ;;  %2172 = vmatprep.mubr.msk.f32.mxu1 %vm2532_vm0, %v2531_v0 }
 0x15d   : > { %v888_v53 = vpop.f32.mrf.mxu0 }
 0x15e   : > { %2173 = vmatmul.mubr.msk.f32.vlgmr.msra.gmra.mxu1 %vm282_vm1, %v888_v53 }
 0x15f   : > { %v2159_v55 = vpop.f32.mrf.mxu0  ;;  %2197 = vmatpush3.msra.mxu1 %v1911_v52  ;;  %2175 = vmatprep.mubr.msk.f32.mxu1 %vm2532_vm0, %v2531_v0 }
 0x160   : > { %2198 = vmatprep.subr.mxu1 %v2531_v0 }
 0x161   : > { %v893_v57 = vpop.f32.mrf.mxu0  ;;  %2199 = vmatpush3.msra.mxu1 %v1910_v54 }
 0x162   : > { %2176 = vmatmul.mubr.msk.f32.gmra.mxu1 %vm282_vm1, %v893_v57  ;;  %2200 = vmatprep.subr.mxu1 %v2531_v0 }
 0x163   : > { %v2162_v58 = vpop.f32.mrf.mxu0  ;;  %2178 = vmatprep.mubr.msk.f32.mxu1 %vm2532_vm0, %v2531_v0  ;;  %2201 = vmatpush3.msra.mxu1 %v1909_v56 }
 0x164   : > { %2226 = vmatprep.subr.mxu1 %v2531_v0 }
 0x165   : > { %v898_v59 = vpop.f32.mrf.mxu0 }
 0x166   : > { %2179 = vmatmul.mubr.msk.f32.gmra.mxu1 %vm282_vm1, %v898_v59 }
 0x167   : > { %v2165_v60 = vpop.f32.mrf.mxu0  ;;  %2202 = vmatprep.mubr.msk.f32.mxu1 %vm2532_vm0, %v2531_v0 }
 0x169   : > { %v1082_v61 = vpop.f32.mrf.mxu0 }
 0x16a   : > { %2203 = vmatmul.mubr.msk.f32.vlgmr.msra.gmra.mxu1 %vm282_vm1, %v1082_v61 }
 0x16b   : > { %v2189_v62 = vpop.f32.mrf.mxu0  ;;  %2227 = vmatpush3.msra.mxu1 %v1911_v52  ;;  %2205 = vmatprep.mubr.msk.f32.mxu1 %vm2532_vm0, %v2531_v0 }
 0x16c   : > { %2228 = vmatprep.subr.mxu1 %v2531_v0 }
 0x16d   : > { %v1087_v63 = vpop.f32.mrf.mxu0  ;;  %2229 = vmatpush3.msra.mxu1 %v1910_v54 }
 0x16e   : > { %2206 = vmatmul.mubr.msk.f32.gmra.mxu1 %vm282_vm1, %v1087_v63  ;;  %2230 = vmatprep.subr.mxu1 %v2531_v0 }
 0x16f   : > { %v2192_v1 = vpop.f32.mrf.mxu0  ;;  %2208 = vmatprep.mubr.msk.f32.mxu1 %vm2532_vm0, %v2531_v0  ;;  %2231 = vmatpush3.msra.mxu1 %v1909_v56 }
 0x170   : > { %2256 = vmatprep.subr.mxu1 %v2531_v0 }
 0x171   : > { %v1092_v2 = vpop.f32.mrf.mxu0 }
 0x172   : > { %2209 = vmatmul.mubr.msk.f32.gmra.mxu1 %vm282_vm1, %v1092_v2 }
 0x173   : > { %v2195_v3 = vpop.f32.mrf.mxu0  ;;  %2232 = vmatprep.mubr.msk.f32.mxu1 %vm2532_vm0, %v2531_v0 }
 0x175   : > { %v1259_v4 = vpop.f32.mrf.mxu0 }
 0x176   : > { %2233 = vmatmul.mubr.msk.f32.vlgmr.msra.gmra.mxu1 %vm282_vm1, %v1259_v4 }
 0x177   : > { %v2219_v5 = vpop.f32.mrf.mxu0  ;;  %2257 = vmatpush3.msra.mxu1 %v1911_v52  ;;  %2235 = vmatprep.mubr.msk.f32.mxu1 %vm2532_vm0, %v2531_v0 }
 0x178   : > { %2258 = vmatprep.subr.mxu1 %v2531_v0 }
 0x179   : > { %v1264_v6 = vpop.f32.mrf.mxu0  ;;  %2259 = vmatpush3.msra.mxu1 %v1910_v54 }
 0x17a   : > { %2236 = vmatmul.mubr.msk.f32.gmra.mxu1 %vm282_vm1, %v1264_v6  ;;  %2260 = vmatprep.subr.mxu1 %v2531_v0 }
 0x17b   : > { %v2222_v7 = vpop.f32.mrf.mxu0  ;;  %2238 = vmatprep.mubr.msk.f32.mxu1 %vm2532_vm0, %v2531_v0  ;;  %2261 = vmatpush3.msra.mxu1 %v1909_v56 }
 0x17c   : > { %2286 = vmatprep.subr.mxu1 %v2531_v0 }
 0x17d   : > { %v1269_v8 = vpop.f32.mrf.mxu0 }
 0x17e   : > { %2239 = vmatmul.mubr.msk.f32.gmra.mxu1 %vm282_vm1, %v1269_v8 }
 0x17f   : > { %v2225_v9 = vpop.f32.mrf.mxu0  ;;  %2262 = vmatprep.mubr.msk.f32.mxu1 %vm2532_vm0, %v2531_v0 }
 0x181   : > { %v1436_v10 = vpop.f32.mrf.mxu0 }
 0x182   : > { %2263 = vmatmul.mubr.msk.f32.vlgmr.msra.gmra.mxu1 %vm282_vm1, %v1436_v10 }
 0x183   : > { %v2249_v11 = vpop.f32.mrf.mxu0  ;;  %2287 = vmatpush3.msra.mxu1 %v1911_v52  ;;  %2265 = vmatprep.mubr.msk.f32.mxu1 %vm2532_vm0, %v2531_v0 }
 0x184   : > { %2288 = vmatprep.subr.mxu1 %v2531_v0 }
 0x185   : > { %v1441_v12 = vpop.f32.mrf.mxu0  ;;  %2289 = vmatpush3.msra.mxu1 %v1910_v54 }
 0x186   : > { %2266 = vmatmul.mubr.msk.f32.gmra.mxu1 %vm282_vm1, %v1441_v12  ;;  %2290 = vmatprep.subr.mxu1 %v2531_v0 }
 0x187   : > { %v2252_v13 = vpop.f32.mrf.mxu0  ;;  %2268 = vmatprep.mubr.msk.f32.mxu1 %vm2532_vm0, %v2531_v0  ;;  %2291 = vmatpush3.msra.mxu1 %v1909_v56 }
 0x189   : > { %v1446_v14 = vpop.f32.mrf.mxu0 }
 0x18a   : > { %2269 = vmatmul.mubr.msk.f32.gmra.mxu1 %vm282_vm1, %v1446_v14 }
 0x18b   : > { %v2255_v15 = vpop.f32.mrf.mxu0  ;;  %2292 = vmatprep.mubr.msk.f32.mxu1 %vm2532_vm0, %v2531_v0 }
 0x18d   : > { %v1613_v16 = vpop.f32.mrf.mxu0 }
 0x18e   : > { %2293 = vmatmul.mubr.msk.f32.vlgmr.msra.gmra.mxu1 %vm282_vm1, %v1613_v16 }
 0x18f   : > { %v2279_v17 = vpop.f32.mrf.mxu0  ;;  %2295 = vmatprep.mubr.msk.f32.mxu1 %vm2532_vm0, %v2531_v0 }
 0x191   : > { %v1618_v18 = vpop.f32.mrf.mxu0 }
 0x192   : > { %2296 = vmatmul.mubr.msk.f32.gmra.mxu1 %vm282_vm1, %v1618_v18 }
 0x193   : > { %v2282_v19 = vpop.f32.mrf.mxu0  ;;  %2298 = vmatprep.mubr.msk.f32.mxu1 %vm2532_vm0, %v2531_v0 }
 0x195   : > { %v1623_v20 = vpop.f32.mrf.mxu0 }
 0x196   : > { %2299 = vmatmul.mubr.msk.f32.gmra.mxu1 %vm282_vm1, %v1623_v20 }
 0x197   : > { %v2285_v21 = vpop.f32.mrf.mxu0 }
 0x1fa   : > { %v447_v22 = vpop.f32.mrf.mxu1 }
 0x1fb   : > { %461 = vst.msk [vmem:[%s3013_s17] sm:$0xff] %vm282_vm1, %v447_v22 }
 0x1fc   : > { %v2084_v23 = vpop.f32.mrf.mxu1 }
 0x1fe   : > { %v452_v24 = vpop.f32.mrf.mxu1 }
 0x1ff   : > { %462 = vst.msk [vmem:[%s3013_s17 + $0x8] sm:$0xff] %vm282_vm1, %v452_v24 }
 0x200   : > { %v2087_v0 = vpop.f32.mrf.mxu1 }
 0x202   : > { %v457_v25 = vpop.f32.mrf.mxu1 }
 0x203   : > { %463 = vst.msk [vmem:[%s3013_s17 + $0x10] sm:$0xff] %vm282_vm1, %v457_v25 }
 0x204   : > { %v2090_v26 = vpop.f32.mrf.mxu1 }
 0x206   : > { %v623_v27 = vpop.f32.mrf.mxu1 }
 0x207   : > { %1879 = vst.msk [vmem:[%s3013_s17 + $0x18] sm:$0xff] %vm282_vm1, %v623_v27 }
 0x208   : > { %v2114_v28 = vpop.f32.mrf.mxu1 }
 0x20a   : > { %v628_v29 = vpop.f32.mrf.mxu1 }
 0x20b   : > { %1880 = vst.msk [vmem:[%s3013_s17 + $0x20] sm:$0xff] %vm282_vm1, %v628_v29 }
 0x20c   : > { %v2117_v30 = vpop.f32.mrf.mxu1 }
 0x20e   : > { %v633_v31 = vpop.f32.mrf.mxu1 }
 0x20f   : > { %1881 = vst.msk [vmem:[%s3013_s17 + $0x28] sm:$0xff] %vm282_vm1, %v633_v31 }
 0x210   : > { %v2120_v32 = vpop.f32.mrf.mxu1 }
 0x212   : > { %v800_v33 = vpop.f32.mrf.mxu1 }
 0x213   : > { %1891 = vst.msk [vmem:[%s3013_s17 + $0x30] sm:$0xff] %vm282_vm1, %v800_v33 }
 0x214   : > { %v2144_v34 = vpop.f32.mrf.mxu1 }
 0x216   : > { %v805_v35 = vpop.f32.mrf.mxu1 }
 0x217   : > { %1892 = vst.msk [vmem:[%s3013_s17 + $0x38] sm:$0xff] %vm282_vm1, %v805_v35 }
 0x218   : > { %v2147_v36 = vpop.f32.mrf.mxu1 }
 0x21a   : > { %v810_v37 = vpop.f32.mrf.mxu1 }
 0x21b   : > { %1893 = vst.msk [vmem:[%s3013_s17 + $0x40] sm:$0xff] %vm282_vm1, %v810_v37 }
 0x21c   : > { %v2150_v38 = vpop.f32.mrf.mxu1 }
 0x21e   : > { %v977_v39 = vpop.f32.mrf.mxu1 }
 0x21f   : > { %1903 = vst.msk [vmem:[%s3013_s17 + $0x48] sm:$0xff] %vm282_vm1, %v977_v39 }
 0x220   : > { %v2174_v40 = vpop.f32.mrf.mxu1 }
 0x222   : > { %v982_v41 = vpop.f32.mrf.mxu1 }
 0x223   : > { %1904 = vst.msk [vmem:[%s3013_s17 + $0x50] sm:$0xff] %vm282_vm1, %v982_v41 }
 0x224   : > { %v2177_v42 = vpop.f32.mrf.mxu1 }
 0x226   : > { %v987_v43 = vpop.f32.mrf.mxu1 }
 0x227   : > { %1905 = vst.msk [vmem:[%s3013_s17 + $0x58] sm:$0xff] %vm282_vm1, %v987_v43 }
 0x228   : > { %v2180_v44 = vpop.f32.mrf.mxu1 }
 0x22a   : > { %v1171_v45 = vpop.f32.mrf.mxu1 }
 0x22b   : > { %1921 = vst.msk [vmem:[%s3013_s17 + $0x60] sm:$0xff] %vm282_vm1, %v1171_v45 }
 0x22c   : > { %v2204_v46 = vpop.f32.mrf.mxu1 }
 0x22e   : > { %v1176_v47 = vpop.f32.mrf.mxu1 }
 0x22f   : > { %1922 = vst.msk [vmem:[%s3013_s17 + $0x68] sm:$0xff] %vm282_vm1, %v1176_v47 }
 0x230   : > { %v2207_v48 = vpop.f32.mrf.mxu1 }
 0x232   : > { %v1181_v49 = vpop.f32.mrf.mxu1 }
 0x233   : > { %1923 = vst.msk [vmem:[%s3013_s17 + $0x70] sm:$0xff] %vm282_vm1, %v1181_v49 }
 0x234   : > { %v2210_v50 = vpop.f32.mrf.mxu1 }
 0x236   : > { %v1348_v51 = vpop.f32.mrf.mxu1 }
 0x237   : > { %1933 = vst.msk [vmem:[%s3013_s17 + $0x78] sm:$0xff] %vm282_vm1, %v1348_v51 }
 0x238   : > { %v2234_v52 = vpop.f32.mrf.mxu1 }
 0x23a   : > { %v1353_v53 = vpop.f32.mrf.mxu1 }
 0x23b   : > { %1934 = vst.msk [vmem:[%s3013_s17 + $0x80] sm:$0xff] %vm282_vm1, %v1353_v53 }
 0x23c   : > { %v2237_v54 = vpop.f32.mrf.mxu1 }
 0x23e   : > { %v1358_v55 = vpop.f32.mrf.mxu1 }
 0x23f   : > { %1935 = vst.msk [vmem:[%s3013_s17 + $0x88] sm:$0xff] %vm282_vm1, %v1358_v55 }
 0x240   : > { %v2240_v56 = vpop.f32.mrf.mxu1 }
 0x242   : > { %v1525_v57 = vpop.f32.mrf.mxu1 }
 0x243   : > { %1945 = vst.msk [vmem:[%s3013_s17 + $0x90] sm:$0xff] %vm282_vm1, %v1525_v57 }
 0x244   : > { %v2264_v58 = vpop.f32.mrf.mxu1 }
 0x246   : > { %v1530_v59 = vpop.f32.mrf.mxu1 }
 0x247   : > { %1946 = vst.msk [vmem:[%s3013_s17 + $0x98] sm:$0xff] %vm282_vm1, %v1530_v59 }
 0x248   : > { %v2267_v60 = vpop.f32.mrf.mxu1 }
 0x24a   : > { %v1535_v61 = vpop.f32.mrf.mxu1 }
 0x24b   : > { %1947 = vst.msk [vmem:[%s3013_s17 + $0xa0] sm:$0xff] %vm282_vm1, %v1535_v61 }
 0x24c   : > { %v2270_v62 = vpop.f32.mrf.mxu1 }
 0x24e   : > { %v1702_v63 = vpop.f32.mrf.mxu1 }
 0x24f   : > { %1957 = vst.msk [vmem:[%s3013_s17 + $0xa8] sm:$0xff] %vm282_vm1, %v1702_v63 }
 0x250   : > { %v2294_v1 = vpop.f32.mrf.mxu1 }
 0x252   : > { %v1707_v2 = vpop.f32.mrf.mxu1 }
 0x253   : > { %1958 = vst.msk [vmem:[%s3013_s17 + $0xb0] sm:$0xff] %vm282_vm1, %v1707_v2 }
 0x254   : > { %v2297_v3 = vpop.f32.mrf.mxu1 }
 0x256   : > { %v1712_v4 = vpop.f32.mrf.mxu1 }
 0x257   : > { %1959 = vst.msk [vmem:[%s3013_s17 + $0xb8] sm:$0xff] %vm282_vm1, %v1712_v4 }
 0x258   : > { %v2300_v5 = vpop.f32.mrf.mxu1 }
 0x259   : > { %2469 = shalt.err (!%p2466_p5)
}
 0x25a   : > { %s2470_s7 = scalar_lea.hbm %s3066_s30, 3072  ;;  %s2474_s28 = scalar_lea.hbm %s3116_s3, 6144 }
 0x25b   : > { %p2471_p6 = scmp.ne.s32.totalorder %s3066_s30, %s2470_s7  ;;  %p2475_p12 = scmp.lt.s32.totalorder %s3066_s30, %s3116_s3 }
 0x25c   : > { %p2476_p4 = scmp.lt.s32.totalorder %s2474_s28, %s2470_s7 }
 0x25d   : > { %p2472_p9 = pnand %p2471_p6, %p3137_p7 }
 0x25e   : > { %p2477_p2 = por %p2476_p4, %p2475_p12 }
 0x25f   : > { %p2473_p11 = pneg %p2472_p9 }
 0x261   : > { %p2478_p13 = pnand %p2477_p2, %p2473_p11 }
 0x263   : > { %2481 = shalt.err (!%p2478_p13)
}
 0x264   : > { %s2534_s9 = smov 128   ;;  %s2535_s10 = smov 8  }
 0x265   : > { %2316 = dma.vmem_to_hbm [thread:$0]  (%p3137_p7), %s3068_s4, 3072, %s3066_s30, %s1721_s16, %s2534_s9, %s2534_s9, %s2535_s10  }
 0x266 PF: > { %s1750_s20 = sand.u32 1, %s2512_s12   ;;  %p3138_p8 = scmp.ne.s32.totalorder %s3128_s24, 0 }
 0x267   : > { %p3139_p10 = scmp.ge.s32.totalorder %s2524_s15, 2  ;;  %s1751_s22 = scalar_lea.sflag [#allocation4], %s1750_s20 }
 0x269   : > { %p2329_p0 = pnand %p3139_p10, %p3138_p8 }
 0x26b   : > { %p2330_p1 = pneg %p2329_p0 }
 0x26d   : > { %2507 = dma.done.wait (%p2330_p1), %s1751_s22, 3072  }
 0x26e   : > { %2509 = vsyncadd (%p2330_p1), %s1751_s22, 4294964224  ;;  %s3140_s17 = sld [smem:[#allocation12_spill]]  ;;  %p19_p3 = scmp.ge.s32.totalorder %s2581_s18, 4  }
 0x26f   : > { %s3141_s14 = sld [smem:[#allocation13_spill]]  ;;  %s3142_s12 = smov %s2516_s13 }
 0x270   : > { %s3144_s15 = smov %s2581_s18  ;;  %21 = sbr.rel (!%p19_p3) target bundleno = 9 (0x9), region = 117 }
 0x274   : > { %s3143_s13 = smov %s3140_s17 }
 0x275   :  { %1756 = vsyncpa [#allocation3], 1 }
 0x276   :  { %1758 = vsyncpa [#allocation3 + $0x1], 1 }
 0x277   :  { %1759 = vsyncpa [#allocation6], 1 }
 0x278   :  { %1761 = vsyncpa [#allocation6 + $0x1], 1 }
 0x279   :  { %1762 = vsyncpa [#allocation4], 1 }
 0x27a   :  { %1764 = vsyncpa [#allocation4 + $0x1], 1 }

</bundles_post_ra>
